<compile_context>
chip_gen: v6e
topology: v6e:2x2x1
jax: 0.10.0
libtpu: 0.0.40
codegen_flags: <defaults>
</compile_context>

<pallas_src>
import jax
import jax.numpy as jnp
from jax import lax
from jax.experimental import pallas as pl
from jax.experimental.pallas import tpu as pltpu


def _ce_ensemble_kernel(*refs):
    """refs = (t_ref, net_0_ref, ..., net_{E-1}_ref, o_ref).

    One grid step handles one batch tile (TN rows) for ALL ensemble members
    and writes a single partial sum (at [0, 0] of an (8, 128) output block).
    """
    t_ref = refs[0]
    o_ref = refs[-1]
    x_refs = refs[1:-1]

    t = t_ref[...]                                   # (TN, 1) int32 targets
    tn = t_ref.shape[0]
    c = x_refs[0].shape[1]

    # Class-index iota / one-hot mask: computed once, reused for every member.
    col = lax.broadcasted_iota(jnp.int32, (tn, c), 1)   # (TN, C)
    onehot = col == t                                    # (TN, C) bool

    partial = jnp.float32(0.0)
    for x_ref in x_refs:                              # static unroll over E members
        x = x_ref[...].astype(jnp.float32)            # in-kernel upcast (native dtype in HBM)
        m = jnp.max(x, axis=-1, keepdims=True)        # (TN, 1)
        d = x - m                                     # shifted logits, reused below
        lse_term = jnp.log(jnp.sum(jnp.exp(d), axis=-1, keepdims=True))        # (TN, 1)
        tgt_shift = jnp.sum(jnp.where(onehot, d, 0.0), axis=-1, keepdims=True)  # (TN, 1)
        # per-row loss = logsumexp(x) - x[t] = lse_term - d[t]
        partial = partial + jnp.sum(lse_term - tgt_shift)

    # Lane-dense unmasked store: partial at [0, 0], zeros elsewhere.
    r = lax.broadcasted_iota(jnp.int32, (8, 128), 0)
    cc = lax.broadcasted_iota(jnp.int32, (8, 128), 1)
    o_ref[...] = jnp.where((r == 0) & (cc == 0), partial, 0.0)


def _vmem_capacity_bytes():
    try:
        return int(pltpu.get_tpu_info().vmem_capacity_bytes)
    except Exception:
        return 64 * 1024 * 1024  # conservative (v7x per-TC)


def _pick_batch_tile(n, c, e, itemsize, vmem_budget_bytes):
    """Largest TN (multiple of 8, divides N) whose double-buffered logits fit."""
    for tn in (1024, 512, 256, 128, 64, 32, 16, 8):
        if n % tn == 0 and 2 * e * tn * c * itemsize <= vmem_budget_bytes:
            return tn
    # Small or irregular batch: one whole-batch tile (block == full array dim).
    return n


def cross_entropy_ensemble(t, *nets):
    """t: (N,) int class indices; each net: (N, C) float logits (any float dtype).

    Returns a float32 scalar = sum over nets of mean cross-entropy loss.
    """
    assert len(nets) >= 1
    n, c = nets[0].shape
    e = len(nets)
    itemsize = max(jnp.dtype(x.dtype).itemsize for x in nets)

    vmem_cap = _vmem_capacity_bytes()
    tn = _pick_batch_tile(n, c, e, itemsize, int(vmem_cap * 0.6))
    num_tiles = max(n // tn, 1)

    # Explicit VMEM limit: double-buffered logits + targets + output + headroom.
    per_step = 2 * e * tn * c * itemsize + 2 * tn * 4 + 2 * 8 * 128 * 4
    vmem_limit = min(int(vmem_cap * 0.9),
                     max(32 * 1024 * 1024, per_step + (4 << 20)))

    t2d = t.astype(jnp.int32).reshape(n, 1)

    in_specs = [pl.BlockSpec((tn, 1), lambda i: (i, 0))]        # targets tile
    for _ in nets:
        in_specs.append(pl.BlockSpec((tn, c), lambda i: (i, 0)))  # logits tile (native dtype)

    out = pl.pallas_call(
        _ce_ensemble_kernel,
        out_shape=jax.ShapeDtypeStruct((num_tiles * 8, 128), jnp.float32),
        grid_spec=pltpu.PrefetchScalarGridSpec(
            num_scalar_prefetch=0,
            grid=(num_tiles,),
            in_specs=in_specs,
            out_specs=pl.BlockSpec((8, 128), lambda i: (i, 0)),   # per-tile partial sums
        ),
        compiler_params=pltpu.CompilerParams(
            dimension_semantics=("parallel",),   # independent output blocks -> parallel grid
            vmem_limit_bytes=vmem_limit,
        ),
    )(t2d, *nets)

    # sum_e mean_i(loss) == (sum over all rows & members) / N  (same N per member)
    return jnp.sum(out) / jnp.float32(n)


def _reference(t, *nets):
    """Plain-JAX reference matching nn.CrossEntropyLoss (reduction='mean')."""
    total = jnp.float32(0.0)
    for x in nets:
        x = x.astype(jnp.float32)
        lse = jax.scipy.special.logsumexp(x, axis=-1)
        tgt = jnp.take_along_axis(x, t[:, None].astype(jnp.int32), axis=-1)[:, 0]
        total = total + jnp.mean(lse - tgt)
    return total


if __name__ == "__main__":
    key = jax.random.PRNGKey(0)

    # --- Small f32 case (single tile, E=3) ---------------------------------
    N, C, E = 8, 16, 3
    k_t, k1, k2, k3, key = jax.random.split(key, 5)
    targets = jax.random.randint(k_t, (N,), 0, C, dtype=jnp.int32)
    net_a = jax.random.normal(k1, (N, C), dtype=jnp.float32)
    net_b = jax.random.normal(k2, (N, C), dtype=jnp.float32)
    net_c = jax.random.normal(k3, (N, C), dtype=jnp.float32)

    loss = jax.block_until_ready(cross_entropy_ensemble(targets, net_a, net_b, net_c))
    ref = _reference(targets, net_a, net_b, net_c)
    assert jnp.allclose(loss, ref, rtol=1e-5, atol=1e-5), (loss, ref)

    # --- bf16 case exercising the in-kernel cast and multi-tile grid -------
    N2, C2 = 2048, 128
    k_t2, k4, k5 = jax.random.split(key, 3)
    targets2 = jax.random.randint(k_t2, (N2,), 0, C2, dtype=jnp.int32)
    net_d = jax.random.normal(k4, (N2, C2), dtype=jnp.float32).astype(jnp.bfloat16)
    net_e = jax.random.normal(k5, (N2, C2), dtype=jnp.float32).astype(jnp.bfloat16)

    loss2 = jax.block_until_ready(cross_entropy_ensemble(targets2, net_d, net_e))
    ref2 = _reference(targets2, net_d, net_e)
    assert jnp.allclose(loss2, ref2, rtol=1e-4, atol=1e-4), (loss2, ref2)

    print("KERNEL_OK")
</pallas_src>

<mosaic_0001>
module attributes {stable_mosaic.version = 11 : i64} {
  func.func @_ce_ensemble_kernel(%arg0: i32, %arg1: memref<8x1xi32, #tpu.memory_space<vmem>>, %arg2: memref<8x16xf32, #tpu.memory_space<vmem>>, %arg3: memref<8x16xf32, #tpu.memory_space<vmem>>, %arg4: memref<8x16xf32, #tpu.memory_space<vmem>>, %arg5: memref<8x128xf32, #tpu.memory_space<vmem>>) attributes {dimension_semantics = [#tpu.dimension_semantics<parallel>], iteration_bounds = array<i64: 1>, scalar_prefetch = 0 : i64, scratch_operands = 0 : i64, tpu.core_type = #tpu.core_type<tc>, window_params = [{transform_indices = @transform_0, window_bounds = array<i64: 8, 1>}, {transform_indices = @transform_1, window_bounds = array<i64: 8, 16>}, {transform_indices = @transform_2, window_bounds = array<i64: 8, 16>}, {transform_indices = @transform_3, window_bounds = array<i64: 8, 16>}, {transform_indices = @transform_4, window_bounds = array<i64: 8, 128>}]} {
    %c0 = arith.constant 0 : index
    %c0_0 = arith.constant 0 : index
    %0 = vector.load %arg1[%c0, %c0_0] : memref<8x1xi32, #tpu.memory_space<vmem>>, vector<8x1xi32>
    %1 = tpu.iota {dimensions = array<i32: 1>} : vector<8x16xi32>
    %2 = vector.broadcast %0 : vector<8x1xi32> to vector<8x16xi32>
    %3 = arith.cmpi eq, %1, %2 : vector<8x16xi32>
    %c0_1 = arith.constant 0 : index
    %c0_2 = arith.constant 0 : index
    %4 = vector.load %arg2[%c0_1, %c0_2] : memref<8x16xf32, #tpu.memory_space<vmem>>, vector<8x16xf32>
    %cst = arith.constant dense<0xFF800000> : vector<8xf32>
    %5 = vector.multi_reduction <maximumf>, %4, %cst [1] : vector<8x16xf32> to vector<8xf32>
    %6 = vector.shape_cast %5 : vector<8xf32> to vector<8x1xf32>
    %7 = vector.broadcast %6 : vector<8x1xf32> to vector<8x16xf32>
    %8 = arith.subf %4, %7 : vector<8x16xf32>
    %9 = math.exp %8 : vector<8x16xf32>
    %cst_3 = arith.constant dense<0.000000e+00> : vector<8xf32>
    %10 = vector.multi_reduction <add>, %9, %cst_3 [1] : vector<8x16xf32> to vector<8xf32>
    %11 = vector.shape_cast %10 : vector<8xf32> to vector<8x1xf32>
    %12 = math.log %11 : vector<8x1xf32>
    %cst_4 = arith.constant 0.000000e+00 : f32
    %13 = vector.broadcast %cst_4 : f32 to vector<8x16xf32>
    %14 = arith.select %3, %8, %13 : vector<8x16xi1>, vector<8x16xf32>
    %cst_5 = arith.constant dense<0.000000e+00> : vector<8xf32>
    %15 = vector.multi_reduction <add>, %14, %cst_5 [1] : vector<8x16xf32> to vector<8xf32>
    %16 = vector.shape_cast %15 : vector<8xf32> to vector<8x1xf32>
    %17 = arith.subf %12, %16 : vector<8x1xf32>
    %18 = vector.shape_cast %17 : vector<8x1xf32> to vector<1x8x1xf32>
    %cst_6 = arith.constant dense<0.000000e+00> : vector<1xf32>
    %19 = vector.multi_reduction <add>, %18, %cst_6 [1, 2] : vector<1x8x1xf32> to vector<1xf32>
    %20 = vector.shape_cast %19 : vector<1xf32> to vector<1x1x1xf32>
    %21 = vector.extract %20[0, 0, 0] : f32 from vector<1x1x1xf32>
    %cst_7 = arith.constant 0.000000e+00 : f32
    %22 = arith.addf %cst_7, %21 : f32
    %c0_8 = arith.constant 0 : index
    %c0_9 = arith.constant 0 : index
    %23 = vector.load %arg3[%c0_8, %c0_9] : memref<8x16xf32, #tpu.memory_space<vmem>>, vector<8x16xf32>
    %cst_10 = arith.constant dense<0xFF800000> : vector<8xf32>
    %24 = vector.multi_reduction <maximumf>, %23, %cst_10 [1] : vector<8x16xf32> to vector<8xf32>
    %25 = vector.shape_cast %24 : vector<8xf32> to vector<8x1xf32>
    %26 = vector.broadcast %25 : vector<8x1xf32> to vector<8x16xf32>
    %27 = arith.subf %23, %26 : vector<8x16xf32>
    %28 = math.exp %27 : vector<8x16xf32>
    %cst_11 = arith.constant dense<0.000000e+00> : vector<8xf32>
    %29 = vector.multi_reduction <add>, %28, %cst_11 [1] : vector<8x16xf32> to vector<8xf32>
    %30 = vector.shape_cast %29 : vector<8xf32> to vector<8x1xf32>
    %31 = math.log %30 : vector<8x1xf32>
    %cst_12 = arith.constant 0.000000e+00 : f32
    %32 = vector.broadcast %cst_12 : f32 to vector<8x16xf32>
    %33 = arith.select %3, %27, %32 : vector<8x16xi1>, vector<8x16xf32>
    %cst_13 = arith.constant dense<0.000000e+00> : vector<8xf32>
    %34 = vector.multi_reduction <add>, %33, %cst_13 [1] : vector<8x16xf32> to vector<8xf32>
    %35 = vector.shape_cast %34 : vector<8xf32> to vector<8x1xf32>
    %36 = arith.subf %31, %35 : vector<8x1xf32>
    %37 = vector.shape_cast %36 : vector<8x1xf32> to vector<1x8x1xf32>
    %cst_14 = arith.constant dense<0.000000e+00> : vector<1xf32>
    %38 = vector.multi_reduction <add>, %37, %cst_14 [1, 2] : vector<1x8x1xf32> to vector<1xf32>
    %39 = vector.shape_cast %38 : vector<1xf32> to vector<1x1x1xf32>
    %40 = vector.extract %39[0, 0, 0] : f32 from vector<1x1x1xf32>
    %41 = arith.addf %22, %40 : f32
    %c0_15 = arith.constant 0 : index
    %c0_16 = arith.constant 0 : index
    %42 = vector.load %arg4[%c0_15, %c0_16] : memref<8x16xf32, #tpu.memory_space<vmem>>, vector<8x16xf32>
    %cst_17 = arith.constant dense<0xFF800000> : vector<8xf32>
    %43 = vector.multi_reduction <maximumf>, %42, %cst_17 [1] : vector<8x16xf32> to vector<8xf32>
    %44 = vector.shape_cast %43 : vector<8xf32> to vector<8x1xf32>
    %45 = vector.broadcast %44 : vector<8x1xf32> to vector<8x16xf32>
    %46 = arith.subf %42, %45 : vector<8x16xf32>
    %47 = math.exp %46 : vector<8x16xf32>
    %cst_18 = arith.constant dense<0.000000e+00> : vector<8xf32>
    %48 = vector.multi_reduction <add>, %47, %cst_18 [1] : vector<8x16xf32> to vector<8xf32>
    %49 = vector.shape_cast %48 : vector<8xf32> to vector<8x1xf32>
    %50 = math.log %49 : vector<8x1xf32>
    %cst_19 = arith.constant 0.000000e+00 : f32
    %51 = vector.broadcast %cst_19 : f32 to vector<8x16xf32>
    %52 = arith.select %3, %46, %51 : vector<8x16xi1>, vector<8x16xf32>
    %cst_20 = arith.constant dense<0.000000e+00> : vector<8xf32>
    %53 = vector.multi_reduction <add>, %52, %cst_20 [1] : vector<8x16xf32> to vector<8xf32>
    %54 = vector.shape_cast %53 : vector<8xf32> to vector<8x1xf32>
    %55 = arith.subf %50, %54 : vector<8x1xf32>
    %56 = vector.shape_cast %55 : vector<8x1xf32> to vector<1x8x1xf32>
    %cst_21 = arith.constant dense<0.000000e+00> : vector<1xf32>
    %57 = vector.multi_reduction <add>, %56, %cst_21 [1, 2] : vector<1x8x1xf32> to vector<1xf32>
    %58 = vector.shape_cast %57 : vector<1xf32> to vector<1x1x1xf32>
    %59 = vector.extract %58[0, 0, 0] : f32 from vector<1x1x1xf32>
    %60 = arith.addf %41, %59 : f32
    %61 = tpu.iota {dimensions = array<i32: 0>} : vector<8x128xi32>
    %62 = tpu.iota {dimensions = array<i32: 1>} : vector<8x128xi32>
    %c0_i32 = arith.constant 0 : i32
    %63 = vector.broadcast %c0_i32 : i32 to vector<8x128xi32>
    %64 = arith.cmpi eq, %61, %63 : vector<8x128xi32>
    %c0_i32_22 = arith.constant 0 : i32
    %65 = vector.broadcast %c0_i32_22 : i32 to vector<8x128xi32>
    %66 = arith.cmpi eq, %62, %65 : vector<8x128xi32>
    %67 = arith.andi %64, %66 : vector<8x128xi1>
    %cst_23 = arith.constant 0.000000e+00 : f32
    %68 = vector.broadcast %60 : f32 to vector<8x128xf32>
    %69 = vector.broadcast %cst_23 : f32 to vector<8x128xf32>
    %70 = arith.select %67, %68, %69 : vector<8x128xi1>, vector<8x128xf32>
    %c0_24 = arith.constant 0 : index
    %c0_25 = arith.constant 0 : index
    %71 = vector.load %arg5[%c0_24, %c0_25] : memref<8x128xf32, #tpu.memory_space<vmem>>, vector<8x128xf32>
    tpu.vector_store %arg5[%c0_24, %c0_25], %70 {strides = array<i32>} : memref<8x128xf32, #tpu.memory_space<vmem>>, vector<8x128xf32>,
    return
  }
  func.func @transform_0(%arg0: i32) -> (i32, i32) {
    %c0_i32 = arith.constant 0 : i32
    %c0_i32_0 = arith.constant 0 : i32
    return %arg0, %c0_i32 : i32, i32
  }
  func.func @transform_1(%arg0: i32) -> (i32, i32) {
    %c0_i32 = arith.constant 0 : i32
    %c0_i32_0 = arith.constant 0 : i32
    return %arg0, %c0_i32 : i32, i32
  }
  func.func @transform_2(%arg0: i32) -> (i32, i32) {
    %c0_i32 = arith.constant 0 : i32
    %c0_i32_0 = arith.constant 0 : i32
    return %arg0, %c0_i32 : i32, i32
  }
  func.func @transform_3(%arg0: i32) -> (i32, i32) {
    %c0_i32 = arith.constant 0 : i32
    %c0_i32_0 = arith.constant 0 : i32
    return %arg0, %c0_i32 : i32, i32
  }
  func.func @transform_4(%arg0: i32) -> (i32, i32) {
    %c0_i32 = arith.constant 0 : i32
    %c0_i32_0 = arith.constant 0 : i32
    return %arg0, %c0_i32 : i32, i32
  }
}

</mosaic_0001>

<bundles_post_ra>
// kernel: tpu_custom_call.1
= control target key start
LH: loop header
LB: loop body
LE: loop exit
PB: predicated region body
PF: predicated region fallthrough
CT: control target
= control target key end

     0   :  { %9 = vsyncpa [#allocation3], 0  ;;  %s314_s0 = inlined_call_operand.vmem [shape: s32[8,1], index: 0, kind: input, shape index: {}]   ;;  %s315_s1 = inlined_call_operand.vmem [shape: f32[8,16], index: 1, kind: input, shape index: {}]   ;;  %s316_s2 = inlined_call_operand.hbm [shape: f32[8,16], index: 2, kind: input, shape index: {}]   ;;  %s317_s3 = inlined_call_operand.hbm [shape: f32[8,16], index: 3, kind: input, shape index: {}]   ;;  %s318_s4 = inlined_call_operand.hbm [shape: f32[8,128], index: 4, kind: output, shape index: {}]  }
   0x1   :  { %10 = vsyncpa [#allocation6], 0 }
   0x2   :  { %11 = vsyncpa [#allocation4], 0  ;;  %s249_s15 = smov [#allocation2]   ;;  %s250_s17 = smov [#allocation5]  }
   0x3   :  { %s22_s16 = sshll.u32 %s249_s15, 4  ;;  %s32_s18 = sshll.u32 %s250_s17, 4  ;;  %s23_s16 = int_to_ptr.vmem [resolvable:$true] %s22_s16  ;;  %s33_s18 = int_to_ptr.vmem [resolvable:$true] %s32_s18 }
   0x4   :  { %s191_s19 = scalar_lea.vmem %s23_s16, 128  ;;  %p196_p1 = scmp.lt.s32.totalorder %s23_s16, %s23_s16 }
   0x5   :  { %p192_p0 = scmp.ne.s32.totalorder %s23_s16, %s191_s19  ;;  %p197_p2 = scmp.lt.s32.totalorder %s191_s19, %s191_s19 }
   0x7   :  { %p198_p3 = por %p197_p2, %p196_p1 }
   0x9   :  { %p199_p4 = pnand %p198_p3, %p192_p0 }
   0xb   :  { %202 = shalt.err (!%p199_p4)
}
   0xc   :  { %25 = dma.hbm_to_vmem [thread:$0]  %s316_s2, 128, %s23_s16, [#allocation3]  }
   0xd   :  { %s211_s22 = scalar_lea.vmem %s33_s18, 128  ;;  %p216_p6 = scmp.lt.s32.totalorder %s33_s18, %s33_s18 }
   0xe   :  { %p212_p5 = scmp.ne.s32.totalorder %s33_s18, %s211_s22  ;;  %p217_p7 = scmp.lt.s32.totalorder %s211_s22, %s211_s22 }
  0x10   :  { %p218_p8 = por %p217_p7, %p216_p6 }
  0x12   :  { %p219_p9 = pnand %p218_p8, %p212_p5 }
  0x14   :  { %222 = shalt.err (!%p219_p9)
}
  0x15   :  { %35 = dma.hbm_to_vmem [thread:$0]  %s317_s3, 128, %s33_s18, [#allocation6]  }
  0x16   :  { %243 = dma.done.wait [#allocation3], 128  }
  0x17   :  { %244 = vsyncadd [#allocation3], 4294967168 }
  0x18   :  { %245 = dma.done.wait [#allocation6], 128  }
  0x19   :  { %246 = vsyncadd [#allocation6], 4294967168  ;;  %v251_v0 = vmov 0   ;;  %vm50_vm0 = vcmask 130048   ;;  %v107_v1 = vld [vmem:[#allocation5] sm:$0xff]  ;;  %v49_v2 = vld [vmem:[%s315_s1] sm:$0xff]  ;;  %v43_v8 = vlaneseq }
  0x1a   :  { %169 = vset.pattern.permute.xlu1 %v251_v0  ;;  %170 = vset.pattern.permute.xlu0 %v251_v0  ;;  %v79_v3 = vld [vmem:[#allocation2] sm:$0xff]  ;;  %v108_v4 = vsel %vm50_vm0, %v107_v1, -inf  ;;  %v51_v5 = vsel %vm50_vm0, %v49_v2, -inf  ;;  %vm67_vm2 = vcmask 7168   ;;  %s252_s29 = smov [#allocation7]  }
  0x1b   :  { %109 = vmax.xlane.f32.xlu1 %v108_v4  ;;  %52 = vmax.xlane.f32.xlu0 %v51_v5  ;;  %v80_v6 = vsel %vm50_vm0, %v79_v3, -inf  ;;  %v42_v7 = vld [vmem:[%s314_s0] sm:$0xff]  ;;  %v294_v12 = vand.u32 127, %v43_v8  ;;  %s149_s30 = sshll.u32 %s252_s29, 4  ;;  %s150_s30 = int_to_ptr.vmem [resolvable:$true] %s149_s30 }
  0x1c   :  { %s223_s6 = scalar_lea.vmem %s150_s30, 128  ;;  %p228_p11 = scmp.lt.s32.totalorder %s150_s30, %s150_s30 }
  0x1d   :  { %vm138_vm4 = vcmp.eq.s32.totalorder %v294_v12, 0  ;;  %p224_p10 = scmp.ne.s32.totalorder %s150_s30, %s223_s6  ;;  %p229_p12 = scmp.lt.s32.totalorder %s223_s6, %s223_s6 }
  0x1f   :  { %81 = vmax.xlane.f32.xlu0 %v80_v6  ;;  %p230_p13 = por %p229_p12, %p228_p11 }
  0x21   :  { %p231_p0 = pnand %p230_p13, %p224_p10 }
  0x2c   :  { %46 = vperm.xlu1 %169, %v42_v7   ;;  %v136_v7 = vshrl.u32 %v43_v8, 7 }
  0x2e   :  { %vm137_vm3 = vcmp.eq.s32.totalorder %v136_v7, 0 }
  0x2f   :  { %vm139_vm5 = vmand %vm137_vm3, %vm138_vm4 }
  0xa4   :  { %v110_v9 = vpop.xlane.xlu1 %109  ;;  %v53_v10 = vpop.xlane.xlu0 %52 }
  0xa5   :  { %v54_v11 = vsub.f32 %v49_v2, %v53_v10  ;;  %v111_v13 = vsub.f32 %v107_v1, %v110_v9 }
  0xa7   :  { %v55_v14 = vmul.f32 1.442695, %v54_v11  ;;  %v112_v18 = vmul.f32 1.442695, %v111_v13 }
  0xa8   :  { %v82_v15 = vpop.xlane.xlu0 %81  ;;  %v47_v16 = vpop.permute.xlu1 %46 }
  0xa9   :  { %v83_v17 = vsub.f32 %v79_v3, %v82_v15  ;;  %vm48_vm1 = vcmp.eq.s32.totalorder %v294_v12, %v47_v16  ;;  %171 = vpow2.f32 %v55_v14 }
  0xaa   :  { %v62_v28 = vsel %vm48_vm1, %v54_v11, 0.0  ;;  %v119_v30 = vsel %vm48_vm1, %v111_v13, 0.0 }
  0xab   :  { %v84_v19 = vmul.f32 1.442695, %v83_v17  ;;  %v91_v20 = vsel %vm48_vm1, %v83_v17, 0.0  ;;  %v63_v29 = vsel %vm50_vm0, %v62_v28, 0.0  ;;  %v120_v31 = vsel %vm50_vm0, %v119_v30, 0.0 }
  0xac   :  { %v92_v21 = vsel %vm50_vm0, %v91_v20, 0.0 }
  0xad   :  { %173 = vpow2.f32 %v84_v19  ;;  %93 = vadd.xlane.f32.xlu1 %v92_v21 }
  0xae   :  { %175 = vpow2.f32 %v112_v18 }
  0xb6   :  { %v172_v22 = vpop.eup %171 }
  0xb7   :  { %v57_v23 = vsel %vm50_vm0, %v172_v22, 0.0 }
  0xb8   :  { %58 = vadd.xlane.f32.xlu0 %v57_v23 }
  0xba   :  { %v174_v24 = vpop.eup %173 }
  0xbb   :  { %v176_v25 = vpop.eup %175  ;;  %v86_v26 = vsel %vm50_vm0, %v174_v24, 0.0 }
  0xbc   :  { %87 = vadd.xlane.f32.xlu0 %v86_v26  ;;  %v114_v27 = vsel %vm50_vm0, %v176_v25, 0.0 }
  0xc0   :  { %115 = vadd.xlane.f32.xlu0 %v114_v27 }
  0xc4   :  { %64 = vadd.xlane.f32.xlu0 %v63_v29 }
  0xc8   :  { %121 = vadd.xlane.f32.xlu0 %v120_v31 }
 0x136   :  { %v94_v42 = vpop.xlane.xlu1 %93 }
 0x141   :  { %v59_v32 = vpop.xlane.xlu0 %58 }
 0x142   :  { %177 = vlog2.f32 %v59_v32 }
 0x145   :  { %v88_v33 = vpop.xlane.xlu0 %87 }
 0x146   :  { %179 = vlog2.f32 %v88_v33 }
 0x149   :  { %v116_v34 = vpop.xlane.xlu0 %115 }
 0x14a   :  { %181 = vlog2.f32 %v116_v34 }
 0x14d   :  { %v65_v37 = vpop.xlane.xlu0 %64 }
 0x14f   :  { %v178_v35 = vpop.eup %177 }
 0x150   :  { %v61_v36 = vmul.f32 0.6931472, %v178_v35 }
 0x151   :  { %v122_v47 = vpop.xlane.xlu0 %121 }
 0x152   :  { %v66_v38 = vsub.f32 %v61_v36, %v65_v37 }
 0x153   :  { %v180_v39 = vpop.eup %179 }
 0x154   :  { %v90_v40 = vmul.f32 0.6931472, %v180_v39  ;;  %v68_v41 = vsel %vm67_vm2, %v66_v38, 0.0 }
 0x155   :  { %69 = vadd.xlane.f32.xlu0 %v68_v41 }
 0x156   :  { %v95_v43 = vsub.f32 %v90_v40, %v94_v42 }
 0x157   :  { %v182_v44 = vpop.eup %181 }
 0x158   :  { %v118_v45 = vmul.f32 0.6931472, %v182_v44  ;;  %v96_v46 = vsel %vm67_vm2, %v95_v43, 0.0 }
 0x159   :  { %97 = vadd.xlane.f32.xlu0 %v96_v46 }
 0x15a   :  { %v123_v48 = vsub.f32 %v118_v45, %v122_v47 }
 0x15c   :  { %v124_v49 = vsel %vm67_vm2, %v123_v48, 0.0 }
 0x15d   :  { %125 = vadd.xlane.f32.xlu0 %v124_v49 }
 0x1de   :  { %v70_v50 = vpop.xlane.xlu0 %69 }
 0x1df   :  { %v71_v51 = vrot.slane %v70_v50, 4 }
 0x1e1   :  { %v72_v52 = vadd.f32 %v71_v51, %v70_v50 }
 0x1e2   :  { %v98_v53 = vpop.xlane.xlu0 %97 }
 0x1e3   :  { %v73_v54 = vrot.slane %v72_v52, 2  ;;  %v99_v55 = vrot.slane %v98_v53, 4 }
 0x1e5   :  { %v100_v56 = vadd.f32 %v99_v55, %v98_v53  ;;  %v74_v57 = vadd.f32 %v73_v54, %v72_v52 }
 0x1e6   :  { %v126_v58 = vpop.xlane.xlu0 %125 }
 0x1e7   :  { %v101_v59 = vrot.slane %v100_v56, 2  ;;  %v127_v60 = vrot.slane %v126_v58, 4  ;;  %v75_v61 = vrot.slane %v74_v57, 1 }
 0x1e9   :  { %v128_v62 = vadd.f32 %v127_v60, %v126_v58  ;;  %v76_v63 = vadd.f32 %v75_v61, %v74_v57  ;;  %v102_v0 = vadd.f32 %v101_v59, %v100_v56 }
 0x1eb   :  { %v129_v1 = vrot.slane %v128_v62, 2  ;;  %159 = vpush %v76_v63  ;;  %v103_v2 = vrot.slane %v102_v0, 1 }
 0x1ed   :  { %v130_v3 = vadd.f32 %v129_v1, %v128_v62  ;;  %v104_v4 = vadd.f32 %v103_v2, %v102_v0 }
 0x1ef   :  { %161 = vpush %v104_v4  ;;  %v131_v5 = vrot.slane %v130_v3, 1 }
 0x1f1   :  { %v132_v6 = vadd.f32 %v131_v5, %v130_v3 }
 0x1f3   :  { %163 = vpush %v132_v6 }
 0x21c   :  { %s160_s0 = spop %159 }
 0x220   :  { %s162_s1 = spop %161 }
 0x221   :  { %s106_s27 = sadd.f32 %s162_s1, %s160_s0 }
 0x224   :  { %s164_s28 = spop %163 }
 0x225   :  { %s134_s5 = sadd.f32 %s164_s28, %s106_s27 }
 0x227   :  { %v140_v9 = vstv %s134_s5 }
 0x228   :  { %v141_v10 = vsel %vm139_vm5, %v140_v9, 0.0 }
 0x229   :  { %142 = vst [vmem:[#allocation7] sm:$0xff] %v141_v10 }
 0x22a   :  { %234 = shalt.err (!%p231_p0)
}
 0x22b   :  { %152 = dma.vmem_to_hbm [thread:$0]  %s150_s30, 128, %s318_s4, [#allocation4]  }
 0x22c   :  { %247 = dma.done.wait [#allocation4], 128  }
 0x22d   :  { %248 = vsyncadd [#allocation4], 4294967168 }
 0x22e   :  { %156 = vsyncpa [#allocation3], 1 }
 0x22f   :  { %157 = vsyncpa [#allocation6], 1 }
 0x230   :  { %158 = vsyncpa [#allocation4], 1 }

</bundles_post_ra>
